<compile_context>
chip_gen: v7x
topology: tpu7x:2x2x1
jax: 0.10.0
libtpu: 0.0.40
codegen_flags: <defaults>
</compile_context>

<pallas_src>
import jax
import jax.numpy as jnp
import numpy as np
from jax import lax
from jax.experimental import pallas as pl
from jax.experimental.pallas import tpu as pltpu


def _round_up(a, b):
    return (a + b - 1) // b * b


def _chip_defaults():
    """Generation-gated tile caps / VMEM budget."""
    vmem_cap = None
    try:
        vmem_cap = int(pltpu.get_tpu_info().vmem_capacity_bytes)
    except Exception:
        pass
    if vmem_cap is None:
        try:
            kind = jax.devices()[0].device_kind.lower()
        except Exception:
            kind = ""
        vmem_cap = 128 * 2**20 if ("v5" in kind or "v6" in kind) else 64 * 2**20
    if vmem_cap >= 100 * 2**20:            # v5e / v6e class (128 MiB physical VMEM)
        return {"tT_cap": 512, "tH_cap": 512, "vmem_limit": 96 * 2**20}
    # v7x class (64 MiB per TensorCore) or unknown -> conservative.
    return {"tT_cap": 512, "tH_cap": 256, "vmem_limit": 48 * 2**20}


def _pick_tile_h(Hp, cap):
    for cand in (512, 256, 128):
        if cand <= cap and Hp % cand == 0:
            return cand
    return Hp


# --------------------------- parameter preparation ---------------------------

def prepare_moe_params(params):
    """One-time weight layout plumbing (do at parameter-load time, NOT per call):
    pad H to a 128-multiple, pre-transpose w1/w3, fuse them into a single
    (E, nH, D, 2*tH) tensor and cast MXU operands to bf16."""
    cfg = _chip_defaults()
    w_gate = jnp.asarray(params["w_gate"], jnp.float32)
    E, D = w_gate.shape
    H = params["w1"].shape[1]
    Hp = _round_up(H, 128)
    tH = _pick_tile_h(Hp, cfg["tH_cap"])
    nH = Hp // tH

    def pad_h(w):                                           # (E, H, D) -> (E, Hp, D)
        return jnp.pad(jnp.asarray(w, jnp.float32), ((0, 0), (0, Hp - H), (0, 0)))

    w1p = pad_h(params["w1"]).astype(jnp.bfloat16)
    w3p = pad_h(params["w3"]).astype(jnp.bfloat16)
    # NOTE: w2 is used as (hidden, dim) per expert, matching this module's
    # einsum; real nn.Linear(hidden, dim) checkpoints store (dim, hidden).
    w2p = pad_h(params["w2"]).astype(jnp.bfloat16)          # (E, Hp, D)

    # (E, D, Hp) -> (E, nH, D, tH) per projection, fused along the last axis.
    w1t = jnp.swapaxes(w1p, 1, 2).reshape(E, D, nH, tH).transpose(0, 2, 1, 3)
    w3t = jnp.swapaxes(w3p, 1, 2).reshape(E, D, nH, tH).transpose(0, 2, 1, 3)
    w13 = jnp.concatenate([w1t, w3t], axis=-1)              # (E, nH, D, 2*tH)

    return {
        "w_gate": w_gate, "w13": w13, "w2": w2p,
        "dim": D, "num_experts": E, "hidden_padded": Hp,
        "tH": tH, "nH": nH,
        "tT_cap": cfg["tT_cap"], "vmem_limit": cfg["vmem_limit"],
    }


# ------------------------------- Pallas kernel -------------------------------

def _moe_gmm_kernel(tile_expert_ref, tile_valid_ref,      # SMEM scalar prefetch
                    x_ref,                                # (tT, D)    bf16
                    w13_ref,                              # (D, 2*tH)  bf16 (w1^T | w3^T)
                    w2_ref,                               # (tH, D)    bf16
                    comb_ref,                             # (tT, 1)    f32 gate weight
                    o_ref):                               # (tT, D)    f32 accumulator
    i = pl.program_id(0)
    h = pl.program_id(1)

    @pl.when(h == 0)
    def _init():
        o_ref[...] = jnp.zeros_like(o_ref)

    # Tail tiles of the padded token-sorted layout carry no real tokens.
    @pl.when(tile_valid_ref[i] != 0)
    def _compute():
        x = x_ref[...]                                                    # bf16
        up = jnp.dot(x, w13_ref[...], preferred_element_type=jnp.float32)  # (tT, 2*tH)
        tH = up.shape[-1] // 2
        h1, h3 = up[:, :tH], up[:, tH:]
        g = (h1 * jax.nn.sigmoid(h1)) * h3                                # SwiGLU, f32
        g = g * comb_ref[...]                                             # pre-scale by gate weight
        o_ref[...] += jnp.dot(g.astype(jnp.bfloat16), w2_ref[...],
                              preferred_element_type=jnp.float32)


# ----------------------- grouped (token-sorted) dispatch ---------------------

def _moe_grouped_ffn(xt, top_idx, top_w, p):
    T, D = xt.shape
    E = p["num_experts"]
    K = top_idx.shape[1]
    TS = T * K
    tH, nH = p["tH"], p["nH"]

    tT = min(p["tT_cap"], _round_up(max(TS, 16), 16))
    # Static worst-case tile count (each expert's group padded to tT rows).
    n_tiles = min(pl.cdiv(TS, tT) + E, E * pl.cdiv(T, tT))
    PT = n_tiles * tT

    # ---- megablocks-style token sort (layout plumbing, in XLA) ----
    flat_e = top_idx.reshape(-1).astype(jnp.int32)                    # (TS,)
    flat_w = top_w.reshape(-1).astype(jnp.float32)
    flat_t = jnp.repeat(jnp.arange(T, dtype=jnp.int32), K)

    order = jnp.argsort(flat_e)
    sorted_e = flat_e[order]
    sorted_t = flat_t[order]
    sorted_w = flat_w[order]

    counts = jnp.sum(jax.nn.one_hot(flat_e, E, dtype=jnp.int32), axis=0)   # (E,)
    csum = jnp.cumsum(counts)
    group_start = csum - counts
    padded_counts = ((counts + tT - 1) // tT) * tT
    pcsum = jnp.cumsum(padded_counts)
    padded_start = pcsum - padded_counts

    pos_in_group = jnp.arange(TS, dtype=jnp.int32) - group_start[sorted_e]
    dest = padded_start[sorted_e] + pos_in_group                      # (TS,) unique rows

    x_sorted = jnp.zeros((PT, D), jnp.bfloat16).at[dest].set(
        xt.astype(jnp.bfloat16)[sorted_t])
    w_sorted = jnp.zeros((PT, 1), jnp.float32).at[dest].set(sorted_w[:, None])

    # Per-tile metadata (scalar-prefetched into SMEM, drives weight index_maps).
    tile_rows = jnp.arange(n_tiles, dtype=jnp.int32) * tT
    tile_expert = jnp.searchsorted(pcsum, tile_rows, side="right").astype(jnp.int32)
    tile_valid = (tile_rows < pcsum[-1]).astype(jnp.int32)
    tile_expert = jnp.minimum(tile_expert, E - 1)                     # clamp tail tiles

    cost = pl.CostEstimate(
        flops=6 * n_tiles * nH * tT * D * tH,
        transcendentals=n_tiles * nH * tT * tH,
        bytes_accessed=PT * D * 6 + n_tiles * nH * 6 * D * tH + PT * 4,
    )

    out_sorted = pl.pallas_call(
        _moe_gmm_kernel,
        out_shape=jax.ShapeDtypeStruct((PT, D), jnp.float32),
        grid_spec=pltpu.PrefetchScalarGridSpec(
            num_scalar_prefetch=2,
            grid=(n_tiles, nH),
            in_specs=[
                pl.BlockSpec((tT, D), lambda i, h, te, tv: (i, 0)),        # x (resident over h)
                pl.BlockSpec((pl.Squeezed(), pl.Squeezed(), D, 2 * tH),
                             lambda i, h, te, tv: (te[i], h, 0, 0)),       # fused w1^T | w3^T
                pl.BlockSpec((pl.Squeezed(), tH, D),
                             lambda i, h, te, tv: (te[i], h, 0)),          # w2
                pl.BlockSpec((tT, 1), lambda i, h, te, tv: (i, 0)),        # gate weights
            ],
            out_specs=pl.BlockSpec((tT, D), lambda i, h, te, tv: (i, 0)),
        ),
        compiler_params=pltpu.CompilerParams(
            dimension_semantics=("parallel", "arbitrary"),
            vmem_limit_bytes=p["vmem_limit"],
        ),
        cost_estimate=cost,
    )(tile_expert, tile_valid, x_sorted, p["w13"], p["w2"], w_sorted)

    # Un-sort: gather each token-slot's row and sum its top-2 contributions
    # (gate weights were already applied inside the kernel).
    slot_out = out_sorted[dest]                                       # (TS, D)
    return jnp.zeros((T, D), jnp.float32).at[sorted_t].add(slot_out)


def moe_feedforward(x, prepared):
    """Pallas implementation of MOEFeedForward.forward; returns (T, dim)."""
    D = prepared["dim"]
    xt = x.reshape(-1, D)
    # Router: tiny lane-sparse matmul + top-2 softmax, kept in plain XLA.
    scores = jnp.dot(xt, prepared["w_gate"].T)
    top_vals, top_idx = lax.top_k(scores, 2)
    top_w = jax.nn.softmax(top_vals, axis=-1)
    return _moe_grouped_ffn(xt, top_idx, top_w, prepared)


# ------------------------------ reference model ------------------------------

def ref_forward(x, params):
    """Mirrors the PyTorch module, with bf16 matmul operands (f32 accumulation)
    so the comparison tolerance vs. the kernel can stay tight."""
    E, D = params["w_gate"].shape
    xt = x.reshape(-1, D)
    scores = jnp.dot(xt, params["w_gate"].T)
    vals, idx = lax.top_k(scores, 2)
    w = jax.nn.softmax(vals, axis=-1)
    xb = xt.astype(jnp.bfloat16)
    w1 = params["w1"][idx].astype(jnp.bfloat16)          # (T, 2, H, D)
    w3 = params["w3"][idx].astype(jnp.bfloat16)
    w2 = params["w2"][idx].astype(jnp.bfloat16)
    h1 = jnp.einsum("ti,taoi->tao", xb, w1, preferred_element_type=jnp.float32)
    h3 = jnp.einsum("ti,taoi->tao", xb, w3, preferred_element_type=jnp.float32)
    g = (h1 * jax.nn.sigmoid(h1)) * h3
    eo = jnp.einsum("tao,taoi->tai", g.astype(jnp.bfloat16), w2,
                    preferred_element_type=jnp.float32)
    return jnp.einsum("tai,ta->ti", eo, w)


# ---------------------------------- main --------------------------------------

if __name__ == "__main__":
    # small config: dim=32, multiple_of=32, num_experts=8 -> hidden_dim=96
    B, S, dim, num_experts, multiple_of = 2, 8, 32, 8, 32
    hidden_dim = 4 * dim
    hidden_dim = int(2 * hidden_dim / 3)
    hidden_dim = multiple_of * ((hidden_dim + multiple_of - 1) // multiple_of)

    key = jax.random.PRNGKey(0)
    k1, k2, k3, k4, k5 = jax.random.split(key, 5)
    params = {
        "w_gate": jax.random.uniform(k1, (num_experts, dim), jnp.float32,
                                     -1.0, 1.0) / jnp.sqrt(float(dim)),
        "w1": jax.random.normal(k2, (num_experts, hidden_dim, dim), jnp.float32),
        "w2": jax.random.normal(k3, (num_experts, hidden_dim, dim), jnp.float32),
        "w3": jax.random.normal(k4, (num_experts, hidden_dim, dim), jnp.float32),
    }
    x = jax.random.normal(k5, (B, S, dim), jnp.float32)

    prepared = prepare_moe_params(params)      # once, at parameter-load time
    out = jax.block_until_ready(moe_feedforward(x, prepared))
    ref = ref_forward(x, params)
    # Reference uses matching bf16 matmul operands; residual difference is only
    # the pre- vs post-down-projection gate scaling rounding.
    np.testing.assert_allclose(np.asarray(out), np.asarray(ref),
                               rtol=2e-2, atol=2.5)
    print("KERNEL_OK")
</pallas_src>

<mosaic_0001>
module attributes {stable_mosaic.version = 11 : i64} {
  func.func @_moe_gmm_kernel(%arg0: i32, %arg1: i32, %arg2: memref<8xi32, #tpu.memory_space<smem>>, %arg3: memref<8xi32, #tpu.memory_space<smem>>, %arg4: memref<32x32xbf16, #tpu.memory_space<vmem>>, %arg5: memref<1x1x32x256xbf16, #tpu.memory_space<vmem>>, %arg6: memref<1x128x32xbf16, #tpu.memory_space<vmem>>, %arg7: memref<32x1xf32, #tpu.memory_space<vmem>>, %arg8: memref<32x32xf32, #tpu.memory_space<vmem>>) attributes {dimension_semantics = [#tpu.dimension_semantics<parallel>, #tpu.dimension_semantics<arbitrary>], iteration_bounds = array<i64: 8, 1>, scalar_prefetch = 2 : i64, scratch_operands = 0 : i64, tpu.core_type = #tpu.core_type<tc>, window_params = [{transform_indices = @transform_0, window_bounds = array<i64: 32, 32>}, {transform_indices = @transform_1, window_bounds = array<i64: 1, 1, 32, 256>}, {transform_indices = @transform_2, window_bounds = array<i64: 1, 128, 32>}, {transform_indices = @transform_3, window_bounds = array<i64: 32, 1>}, {transform_indices = @transform_4, window_bounds = array<i64: 32, 32>}]} {
    %c0_i32 = arith.constant 0 : i32
    %0 = arith.cmpi eq, %arg1, %c0_i32 : i32
    %1 = arith.extui %0 : i1 to i32
    %c0_i32_0 = arith.constant 0 : i32
    %2 = arith.cmpi ne, %1, %c0_i32_0 : i32
    scf.if %2 {
      %cst = arith.constant 0.000000e+00 : f32
      %8 = vector.broadcast %cst : f32 to vector<32x32xf32>
      %c0 = arith.constant 0 : index
      %c0_3 = arith.constant 0 : index
      %9 = vector.load %arg8[%c0, %c0_3] : memref<32x32xf32, #tpu.memory_space<vmem>>, vector<32x32xf32>
      tpu.vector_store %arg8[%c0, %c0_3], %8 {strides = array<i32>} : memref<32x32xf32, #tpu.memory_space<vmem>>, vector<32x32xf32>,
    } else {
    }
    %3 = arith.index_cast %arg0 : i32 to index
    %4 = memref.load %arg3[%3] : memref<8xi32, #tpu.memory_space<smem>>
    %c0_i32_1 = arith.constant 0 : i32
    %5 = arith.cmpi ne, %4, %c0_i32_1 : i32
    %6 = arith.extui %5 : i1 to i32
    %c0_i32_2 = arith.constant 0 : i32
    %7 = arith.cmpi ne, %6, %c0_i32_2 : i32
    scf.if %7 {
      %c0 = arith.constant 0 : index
      %c0_3 = arith.constant 0 : index
      %8 = vector.load %arg4[%c0, %c0_3] : memref<32x32xbf16, #tpu.memory_space<vmem>>, vector<32x32xbf16>
      %c0_4 = arith.constant 0 : index
      %c0_5 = arith.constant 0 : index
      %c0_6 = arith.constant 0 : index
      %c0_7 = arith.constant 0 : index
      %9 = vector.load %arg5[%c0_4, %c0_5, %c0_6, %c0_7] : memref<1x1x32x256xbf16, #tpu.memory_space<vmem>>, vector<1x1x32x256xbf16>
      %10 = vector.shape_cast %9 : vector<1x1x32x256xbf16> to vector<32x256xbf16>
      %cst = arith.constant dense<0.000000e+00> : vector<32x256xf32>
      %11 = tpu.matmul %8, %10, %cst {dimension_numbers = #tpu.dot_dimension_numbers<[1], [0], [0], [1], [0, 0, 1, 1], [], []>} : vector<32x32xbf16>, vector<32x256xbf16>, vector<32x256xf32> -> vector<32x256xf32>
      %12 = vector.extract_strided_slice %11 {offsets = [0, 0], sizes = [32, 128], strides = [1, 1]} : vector<32x256xf32> to vector<32x128xf32>
      %13 = vector.extract_strided_slice %11 {offsets = [0, 128], sizes = [32, 128], strides = [1, 1]} : vector<32x256xf32> to vector<32x128xf32>
      %14 = arith.negf %12 : vector<32x128xf32>
      %15 = math.exp %14 : vector<32x128xf32>
      %cst_8 = arith.constant 1.000000e+00 : f32
      %16 = vector.broadcast %cst_8 : f32 to vector<32x128xf32>
      %17 = arith.addf %16, %15 : vector<32x128xf32>
      %18 = arith.divf %16, %17 : vector<32x128xf32>
      %19 = arith.mulf %12, %18 : vector<32x128xf32>
      %20 = arith.mulf %19, %13 : vector<32x128xf32>
      %c0_9 = arith.constant 0 : index
      %c0_10 = arith.constant 0 : index
      %21 = vector.load %arg7[%c0_9, %c0_10] : memref<32x1xf32, #tpu.memory_space<vmem>>, vector<32x1xf32>
      %22 = vector.broadcast %21 : vector<32x1xf32> to vector<32x128xf32>
      %23 = arith.mulf %20, %22 : vector<32x128xf32>
      %c0_11 = arith.constant 0 : index
      %c0_12 = arith.constant 0 : index
      %24 = vector.load %arg8[%c0_11, %c0_12] : memref<32x32xf32, #tpu.memory_space<vmem>>, vector<32x32xf32>
      %25 = arith.truncf %23 : vector<32x128xf32> to vector<32x128xbf16>
      %c0_13 = arith.constant 0 : index
      %c0_14 = arith.constant 0 : index
      %c0_15 = arith.constant 0 : index
      %26 = vector.load %arg6[%c0_13, %c0_14, %c0_15] : memref<1x128x32xbf16, #tpu.memory_space<vmem>>, vector<1x128x32xbf16>
      %27 = vector.shape_cast %26 : vector<1x128x32xbf16> to vector<128x32xbf16>
      %cst_16 = arith.constant dense<0.000000e+00> : vector<32x32xf32>
      %28 = tpu.matmul %25, %27, %cst_16 {dimension_numbers = #tpu.dot_dimension_numbers<[1], [0], [0], [1], [0, 0, 1, 1], [], []>} : vector<32x128xbf16>, vector<128x32xbf16>, vector<32x32xf32> -> vector<32x32xf32>
      %29 = arith.addf %24, %28 : vector<32x32xf32>
      %c0_17 = arith.constant 0 : index
      %c0_18 = arith.constant 0 : index
      %30 = vector.load %arg8[%c0_17, %c0_18] : memref<32x32xf32, #tpu.memory_space<vmem>>, vector<32x32xf32>
      tpu.vector_store %arg8[%c0_17, %c0_18], %29 {strides = array<i32>} : memref<32x32xf32, #tpu.memory_space<vmem>>, vector<32x32xf32>,
    } else {
    }
    return
  }
  func.func @transform_0(%arg0: i32, %arg1: i32, %arg2: memref<8xi32, #tpu.memory_space<smem>>, %arg3: memref<8xi32, #tpu.memory_space<smem>>) -> (i32, i32) {
    %c0_i32 = arith.constant 0 : i32
    %c0_i32_0 = arith.constant 0 : i32
    return %arg0, %c0_i32 : i32, i32
  }
  func.func @transform_1(%arg0: i32, %arg1: i32, %arg2: memref<8xi32, #tpu.memory_space<smem>>, %arg3: memref<8xi32, #tpu.memory_space<smem>>) -> (i32, i32, i32, i32) {
    %0 = arith.index_cast %arg0 : i32 to index
    %1 = memref.load %arg2[%0] : memref<8xi32, #tpu.memory_space<smem>>
    %c0_i32 = arith.constant 0 : i32
    %c0_i32_0 = arith.constant 0 : i32
    %c0_i32_1 = arith.constant 0 : i32
    return %1, %arg1, %c0_i32, %c0_i32_0 : i32, i32, i32, i32
  }
  func.func @transform_2(%arg0: i32, %arg1: i32, %arg2: memref<8xi32, #tpu.memory_space<smem>>, %arg3: memref<8xi32, #tpu.memory_space<smem>>) -> (i32, i32, i32) {
    %0 = arith.index_cast %arg0 : i32 to index
    %1 = memref.load %arg2[%0] : memref<8xi32, #tpu.memory_space<smem>>
    %c0_i32 = arith.constant 0 : i32
    %c0_i32_0 = arith.constant 0 : i32
    return %1, %arg1, %c0_i32 : i32, i32, i32
  }
  func.func @transform_3(%arg0: i32, %arg1: i32, %arg2: memref<8xi32, #tpu.memory_space<smem>>, %arg3: memref<8xi32, #tpu.memory_space<smem>>) -> (i32, i32) {
    %c0_i32 = arith.constant 0 : i32
    %c0_i32_0 = arith.constant 0 : i32
    return %arg0, %c0_i32 : i32, i32
  }
  func.func @transform_4(%arg0: i32, %arg1: i32, %arg2: memref<8xi32, #tpu.memory_space<smem>>, %arg3: memref<8xi32, #tpu.memory_space<smem>>) -> (i32, i32) {
    %c0_i32 = arith.constant 0 : i32
    %c0_i32_0 = arith.constant 0 : i32
    return %arg0, %c0_i32 : i32, i32
  }
}

</mosaic_0001>

<bundles_post_ra>
// kernel: tpu_custom_call.1
= control target key start
LH: loop header
LB: loop body
LE: loop exit
PB: predicated region body
PF: predicated region fallthrough
CT: control target
= control target key end

     0   :  { %s1060_s0 = inlined_call_operand.vmem [shape: s32[8], index: 0, kind: input, shape index: {}]   ;;  %s1061_s2 = inlined_call_operand.vmem [shape: bf16[256,32], index: 2, kind: input, shape index: {}]   ;;  %s1062_s3 = inlined_call_operand.vmem [shape: bf16[8,1,32,256], index: 3, kind: input, shape index: {}]   ;;  %s1063_s4 = inlined_call_operand.vmem [shape: bf16[8,128,32], index: 4, kind: input, shape index: {}]   ;;  %s1064_s5 = inlined_call_operand.vmem [shape: f32[256,1], index: 5, kind: input, shape index: {}]   ;;  %s1065_s6 = inlined_call_operand.vmem [shape: f32[256,32], index: 6, kind: output, shape index: {}]   ;;  %s1066_s1 = inlined_call_operand.vmem [shape: s32[8], index: 1, kind: input, shape index: {}]  }
   0x1   :  { %s11_s23 = sshll.u32 %s1060_s0, 4  ;;  %s15_s26 = sshll.u32 %s1066_s1, 4  ;;  %s12_s23 = int_to_ptr.vmem [resolvable:$true] %s11_s23  ;;  %s16_s26 = int_to_ptr.vmem [resolvable:$true] %s15_s26 }
   0x2   :  { %s879_s27 = scalar_lea.vmem %s12_s23, 16  ;;  %p884_p1 = scmp.lt.s32.totalorder %s12_s23, %s12_s23 }
   0x3   :  { %p880_p0 = scmp.ne.s32.totalorder %s12_s23, %s879_s27  ;;  %p885_p2 = scmp.lt.s32.totalorder %s879_s27, %s879_s27 }
   0x5   :  { %p886_p3 = por %p885_p2, %p884_p1 }
   0x7   :  { %p887_p4 = pnand %p886_p3, %p880_p0 }
   0x9   :  { %890 = shalt.err (!%p887_p4)  }
   0xa   :  { %s929_s28 = smov [#allocation3]   ;;  %s891_s29 = scalar_lea.vmem %s16_s26, 16 }
   0xb   :  { %14 = dma.vmem_to_smem %s12_s23, 16, %s929_s28, [#allocation2] }
   0xc   :  { %p892_p5 = scmp.ne.s32.totalorder %s16_s26, %s891_s29  ;;  %p896_p6 = scmp.lt.s32.totalorder %s16_s26, %s16_s26 }
   0xd   :  { %p897_p7 = scmp.lt.s32.totalorder %s891_s29, %s891_s29 }
   0xf   :  { %p898_p8 = por %p897_p7, %p896_p6 }
  0x11   :  { %p899_p9 = pnand %p898_p8, %p892_p5 }
  0x13   :  { %902 = shalt.err (!%p899_p9)  }
  0x14   :  { %s930_s0 = smov [#allocation4]  }
  0x15   :  { %18 = dma.vmem_to_smem %s16_s26, 16, %s930_s0, [#allocation2] }
  0x16   :  { %915 = dma.done.wait [#allocation2], 32 }
  0x17   :  { %916 = vsyncadd [#allocation2], 4294967264 }
  0x18   :  { %20 = sfence }
  0x19   :  { %s974_s1 = smov 0   ;;  %s976_s30 = smov 0  }
  0x1a   :  { %s978_s7 = smov 0  }
  0x1b LB: > { %s38_s8 = sadd.s32 1, %s923_s30  ;;  %p751_p10 = scmp.ge.s32.totalorder %s927_s7, 1  ;;  %s927_s7 = sphi %s978_s7, %s26_s7   ;;  %s923_s30 = sphi %s976_s30, %s1068_s30   ;;  %s919_s1 = sphi %s974_s1, %s1067_s1  }
  0x1c   : > { %p40_p11 = scmp.ge.s32.totalorder %s38_s8, 8  ;;  %p239_p12 = scmp.lt.s32.totalorder %s927_s7, 9 }
  0x1e   : > { %s1070_s8 = smov (%p40_p11, %s38_s8), 0  ;;  %p240_p13 = pnand %p751_p10, %p239_p12 }
  0x1f   : > { %s752_s9 = sshll.u32 (!%p240_p13), %s919_s1, 2  ;;  %s296_s10 = sld [smem:[#allocation3 + %s919_s1]] (!%p240_p13)  ;;  %vm336_vm0 = vcmask (!%p240_p13), 261120   ;;  %v931_v0 = vmov (!%p240_p13), 0.0  }
  0x20   : > { %243 = sbr.rel (%p240_p13) target bundleno = 530 (0x212), region = 36  ;;  %p291_p0 = scmp.lt.s32.totalorder (!%p240_p13), %s752_s9, 31 }
  0x21   : > { %s307_s11 = sld [smem:[#allocation3 + %s919_s1]] (!%p240_p13) }
  0x22   : > { %s341_s12 = sld [smem:[#allocation4 + %s919_s1]] (!%p240_p13) }
  0x25   : > { %p297_p1 = scmp.lt.s32.totalorder (!%p240_p13), %s296_s10, 7 }
  0x27   : > { %s1072_s9 = smov (!%p291_p0, %s752_s9), 31  ;;  %p309_p2 = scmp.lt.s32.totalorder %s307_s11, 7 }
  0x28   : > { %s753_s13 = sshll.u32 %s1072_s9, 2  ;;  %s759_s14 = sshll.u32 %s1072_s9, 3 }
  0x29   : > { %s995_s17 = scalar_lea.vmem %s1061_s2, %s753_s13  ;;  %s1000_s20 = scalar_lea.vmem %s1064_s5, %s759_s14 }
  0x2a   : > { %s1074_s10 = smov (!%p297_p1, %s296_s10), 7  ;;  %s1076_s11 = smov (!%p309_p2, %s307_s11), 7 }
  0x2b   : > { %s785_s21 = sshll.u32 %s1074_s10, 5  ;;  %s1005_s24 = scalar_lea.vmem %s1065_s6, %s759_s14 }
  0x2c   : > { %s305_s27 = scalar_lea.vmem %s1062_s3, %s785_s21  ;;  %s786_s28 = sshll.u32 %s1076_s11, 6  ;;  %337 = vst.msk [vmem:[%s1005_s24] sm:$0xff] %vm336_vm0, %v931_v0  ;;  %338 = vst.msk [vmem:[%s1005_s24 + $0x8] sm:$0xff] %vm336_vm0, %v931_v0 }
  0x2d   : > { %339 = vst.msk [vmem:[%s1005_s24 + $0x10] sm:$0xff] %vm336_vm0, %v931_v0  ;;  %340 = vst.msk [vmem:[%s1005_s24 + $0x18] sm:$0xff] %vm336_vm0, %v931_v0  ;;  %s1021_s1 = scalar_lea.vmem %s1063_s4, %s786_s28  ;;  %p762_p3 = scmp.eq.s32.totalorder %s341_s12, 0 }
  0x2e   : > { %v847_v1 = vld [vmem:[%s305_s27 + $0x4] ss:$8 sps:$4 sm:$0xff] (!%p762_p3)   ;;  %v849_v2 = vld [vmem:[%s305_s27] ss:$8 sps:$4 sm:$0xff] (!%p762_p3)   ;;  %v932_v3 = vmov (!%p762_p3), 0   ;;  %v478_v8 = vld [vmem:[%s1000_s20 + $0x10] sm:$0xff] (!%p762_p3) }
  0x2f   : > { %345 = sbr.rel (%p762_p3) target bundleno = 530 (0x212), region = 44  ;;  %423 = vmatprep.mubr.bf16.mxu0 (!%p762_p3), %v932_v3  ;;  %845 = vset.pattern.permute.xlu0 (!%p762_p3), %v932_v3  ;;  %v850_v4 = vld [vmem:[%s305_s27 + $0x14] ss:$8 sps:$4 sm:$0xff] (!%p762_p3)   ;;  %v852_v5 = vld [vmem:[%s305_s27 + $0x10] ss:$8 sps:$4 sm:$0xff] (!%p762_p3)   ;;  %v853_v6 = vld [vmem:[%s995_s17] sm:$0xff] (!%p762_p3)  }
  0x30   : > { %391 = vmatprep.subr.bf16.mxu0 (!%p762_p3), %v847_v1  ;;  %846 = vset.pattern.permute.xlu1 (!%p762_p3), %v932_v3  ;;  %v476_v7 = vld [vmem:[%s1000_s20] sm:$0xff] (!%p762_p3)  ;;  %v477_v9 = vld [vmem:[%s1000_s20 + $0x8] sm:$0xff] (!%p762_p3)  ;;  %v479_v10 = vld [vmem:[%s1000_s20 + $0x18] sm:$0xff] (!%p762_p3) }
  0x31   : > { %392 = vmatpush1.bf16.msra.mxu0 (!%p762_p3), %v849_v2  ;;  %482 = vperm.xlu0 (!%p762_p3), %845, %v476_v7   ;;  %v854_v11 = vld [vmem:[%s995_s17 + $0x8] sm:$0xff] (!%p762_p3)   ;;  %v855_v12 = vld [vmem:[%s1021_s1] sm:$0xff] (!%p762_p3)   ;;  %v857_v14 = vld [vmem:[%s1021_s1 + $0x10] sm:$0xff] (!%p762_p3)  }
  0x32   : > { %393 = vmatprep.subr.bf16.mxu0 (!%p762_p3), %v850_v4  ;;  %492 = vperm.xlu1 (!%p762_p3), %846, %v478_v8   ;;  %v856_v13 = vld [vmem:[%s1021_s1 + $0x8] sm:$0xff] (!%p762_p3)   ;;  %v858_v15 = vld [vmem:[%s1021_s1 + $0x18] sm:$0xff] (!%p762_p3)   ;;  %v859_v16 = vld [vmem:[%s1021_s1 + $0x20] sm:$0xff] (!%p762_p3)  }
  0x33   : > { %797 = vmatprep.subr.bf16.mxu1 (!%p762_p3), %v855_v12  ;;  %v860_v17 = vld [vmem:[%s1021_s1 + $0x28] sm:$0xff] (!%p762_p3)   ;;  %v861_v18 = vld [vmem:[%s1021_s1 + $0x30] sm:$0xff] (!%p762_p3)   ;;  %v862_v19 = vld [vmem:[%s1021_s1 + $0x38] sm:$0xff] (!%p762_p3)  }
  0x34   : > { %798 = vmatpush3.bf16.msra.mxu1 (!%p762_p3), %v855_v12  ;;  %v506_v62 = vld [vmem:[%s1005_s24 + $0x10] sm:$0xff] (!%p762_p3)  ;;  %v504_v63 = vld [vmem:[%s1005_s24] sm:$0xff] (!%p762_p3)  ;;  %v507_v1 = vld [vmem:[%s1005_s24 + $0x18] sm:$0xff] (!%p762_p3) }
  0x35   : > { %394 = vmatpush1.bf16.msra.mxu0 (!%p762_p3), %v852_v5  ;;  %487 = vperm.xlu0 (!%p762_p3), %845, %v477_v9   ;;  %v505_v4 = vld [vmem:[%s1005_s24 + $0x8] sm:$0xff] (!%p762_p3) }
  0x36   : > { %497 = vperm.xlu1 %846, %v479_v10   ;;  %799 = vmatprep.subr.bf16.mxu1 %v856_v13 }
  0x38   : > { %769 = vmatmul.mubr.msk.bf16.vlgmr.msra.gmra.mrb[0].mxu0 %vm336_vm0, %v853_v6  ;;  %800 = vmatpush3.bf16.msra.mxu1 %v856_v13 }
  0x39   : > { %433 = vmatprep.mubr.bf16.mxu0 %v932_v3  ;;  %801 = vmatprep.subr.bf16.mxu1 %v857_v14 }
  0x3c   : > { %802 = vmatpush3.bf16.msra.mxu1 %v857_v14 }
  0x3d   : > { %803 = vmatprep.subr.bf16.mxu1 %v858_v15 }
  0x40   : > { %770 = vmatmul.mubr.msk.bf16.gmra.mrb[4].mxu0 %vm336_vm0, %v854_v11  ;;  %804 = vmatpush3.bf16.msra.mxu1 %v858_v15 }
  0x41   : > { %805 = vmatprep.subr.bf16.mxu1 %v859_v16 }
  0x44   : > { %806 = vmatpush3.bf16.msra.mxu1 %v859_v16 }
  0x45   : > { %807 = vmatprep.subr.bf16.mxu1 %v860_v17 }
  0x48   : > { %808 = vmatpush3.bf16.msra.mxu1 %v860_v17 }
  0x49   : > { %809 = vmatprep.subr.bf16.mxu1 %v861_v18 }
  0x4c   : > { %810 = vmatpush3.bf16.msra.mxu1 %v861_v18 }
  0x4d   : > { %811 = vmatprep.subr.bf16.mxu1 %v862_v19 }
  0x50   : > { %812 = vmatpush3.bf16.msra.mxu1 %v862_v19 }
  0xb0   : > { %v483_v40 = vpop.permute.xlu0 %482 }
  0xb1   : > { %v493_v51 = vpop.permute.xlu1 %492 }
  0xb4   : > { %v488_v46 = vpop.permute.xlu0 %487 }
  0xb5   : > { %v498_v58 = vpop.permute.xlu1 %497 }
 0x10b   : > { %v425_v20 = vpop.f32.mrb[0].mxu0 }
 0x10c   : > { %v771_v21 = vmul.f32 -1.442695, %v425_v20  ;;  %v427_v22 = vpop.f32.mrb[1].mxu0 }
 0x10d   : > { %v429_v23 = vpop.f32.mrb[2].mxu0 }
 0x10e   : > { %863 = vpow2.f32 %v771_v21  ;;  %v772_v24 = vmul.f32 -1.442695, %v429_v23  ;;  %v431_v25 = vpop.f32.mrb[3].mxu0 }
 0x110   : > { %865 = vpow2.f32 %v772_v24 }
 0x113   : > { %v435_v26 = vpop.f32.mrb[4].mxu0 }
 0x114   : > { %v773_v27 = vmul.f32 -1.442695, %v435_v26  ;;  %v437_v28 = vpop.f32.mrb[5].mxu0 }
 0x115   : > { %v439_v29 = vpop.f32.mrb[6].mxu0 }
 0x116   : > { %867 = vpow2.f32 %v773_v27  ;;  %v774_v30 = vmul.f32 -1.442695, %v439_v29  ;;  %v441_v31 = vpop.f32.mrb[7].mxu0 }
 0x118   : > { %v864_v32 = vpop.eup %863  ;;  %869 = vpow2.f32 %v774_v30 }
 0x119   : > { %v456_v33 = vadd.f32 1.0, %v864_v32 }
 0x11a   : > { %v866_v34 = vpop.eup %865 }
 0x11b   : > { %871 = vrcp.f32 %v456_v33  ;;  %v457_v35 = vadd.f32 1.0, %v866_v34 }
 0x11d   : > { %873 = vrcp.f32 %v457_v35 }
 0x120   : > { %v868_v36 = vpop.eup %867 }
 0x121   : > { %v458_v37 = vadd.f32 1.0, %v868_v36 }
 0x122   : > { %v870_v38 = vpop.eup %869 }
 0x123   : > { %875 = vrcp.f32 %v458_v37  ;;  %v459_v39 = vadd.f32 1.0, %v870_v38 }
 0x125   : > { %v872_v41 = vpop.eup %871  ;;  %877 = vrcp.f32 %v459_v39 }
 0x126   : > { %v468_v42 = vmul.f32 %v872_v41, %v425_v20 }
 0x127   : > { %v874_v43 = vpop.eup %873 }
 0x128   : > { %v472_v44 = vmul.f32 %v468_v42, %v427_v22  ;;  %v469_v45 = vmul.f32 %v874_v43, %v429_v23 }
 0x12a   : > { %v473_v47 = vmul.f32 %v469_v45, %v431_v25  ;;  %v500_v48 = vmul.f32 %v483_v40, %v472_v44 }
 0x12c   : > { %v501_v49 = vmul.f32 %v488_v46, %v473_v47 }
 0x12d   : > { %v876_v50 = vpop.eup %875 }
 0x12e   : > { %v470_v52 = vmul.f32 %v876_v50, %v435_v26  ;;  %v508_v53 = vpack.c.bf16 %v501_v49, %v500_v48 }
 0x12f   : > { %v878_v54 = vpop.eup %877 }
 0x130   : > { %v474_v55 = vmul.f32 %v470_v52, %v437_v28  ;;  %v471_v56 = vmul.f32 %v878_v54, %v439_v29  ;;  %813 = vmatprep.mubr.bf16.mxu1 %v508_v53 }
 0x132   : > { %v475_v57 = vmul.f32 %v471_v56, %v441_v31  ;;  %v502_v59 = vmul.f32 %v493_v51, %v474_v55 }
 0x134   : > { %v503_v60 = vmul.f32 %v498_v58, %v475_v57 }
 0x136   : > { %v509_v61 = vpack.c.bf16 %v503_v60, %v502_v59 }
 0x138   : > { %814 = vmatmul.mubr.bf16.vlgmr.msra.gmra.mrb[0].mxu1 %v509_v61 }
 0x20b   : > { %v815_v0 = vpop.f32.mrb[0].mxu1 }
 0x20c   : > { %v625_v2 = vadd.f32 %v815_v0, %v506_v62  ;;  %v608_v3 = vpop.f32.mrb[1].mxu1 }
 0x20d   : > { %v623_v5 = vadd.f32 %v608_v3, %v504_v63  ;;  %v816_v6 = vpop.f32.mrb[2].mxu1 }
 0x20e   : > { %629 = vst.msk [vmem:[%s1005_s24 + $0x10] sm:$0xff] %vm336_vm0, %v625_v2  ;;  %v626_v7 = vadd.f32 %v816_v6, %v507_v1  ;;  %v611_v8 = vpop.f32.mrb[3].mxu1 }
 0x20f   : > { %627 = vst.msk [vmem:[%s1005_s24] sm:$0xff] %vm336_vm0, %v623_v5  ;;  %v624_v9 = vadd.f32 %v611_v8, %v505_v4 }
 0x210   : > { %630 = vst.msk [vmem:[%s1005_s24 + $0x18] sm:$0xff] %vm336_vm0, %v626_v7 }
 0x211   : > { %628 = vst.msk [vmem:[%s1005_s24 + $0x8] sm:$0xff] %vm336_vm0, %v624_v9 }
 0x212 PF: > { %s26_s7 = sadd.s32 1, %s927_s7   ;;  %s1067_s1 = smov %s923_s30 }
 0x213   : > { %p23_p4 = scmp.ge.s32.totalorder %s26_s7, 10   ;;  %s1068_s30 = smov %s1070_s8 }
 0x215   :  { %25 = sbr.rel (!%p23_p4) target bundleno = 27 (0x1b), region = 83 }

</bundles_post_ra>
